<compile_context>
chip_gen: v7x
topology: tpu7x:2x2x1
jax: 0.10.0
libtpu: 0.0.40
codegen_flags: <defaults>
</compile_context>

<pallas_src>
import functools
import math

import numpy as np
import jax
import jax.numpy as jnp
from jax.experimental import pallas as pl
from jax.experimental.pallas import tpu as pltpu


_VMEM_LIMIT = 32 * 1024 * 1024  # fused working set is a few KB; plenty of v7x headroom


# ----------------------------------------------------------------------------
# In-register building blocks
# ----------------------------------------------------------------------------
def _reflect_pad_w(x, padl, padr):
    """Reflection-pad a (C, W) tile along the lane (width) axis, in registers."""
    if padl == 0 and padr == 0:
        return x
    W = x.shape[1]
    parts = []
    for i in range(padl):                                  # out[i] = x[padl - i]
        parts.append(x[:, padl - i:padl - i + 1])
    parts.append(x)
    for i in range(padr):                                  # out[padl + W + i] = x[W - 2 - i]
        parts.append(x[:, W - 2 - i:W - 1 - i])
    return jnp.concatenate(parts, axis=1)


def _conv1xkw_packed(pad_parts, wflat, bias, kw):
    """'valid' (1, kw) conv of per-batch reflect-padded tiles as ONE MXU matmul.

    pad_parts: list of B (Cin, Wp) f32 register tiles (one per batch element).
    wflat:     (Cout, kw*Cin) bf16, column index = tap * Cin + channel.
    bias:      (Cout, 1) f32.
    Returns (Cout, B*Wc) f32 with Wc = Wp - kw + 1, batch segments contiguous.
    """
    Wp = pad_parts[0].shape[1]
    Wc = Wp - kw + 1
    taps = []
    for k in range(kw):
        taps.append(jnp.concatenate([p[:, k:k + Wc] for p in pad_parts], axis=1))
    im2col = jnp.concatenate(taps, axis=0).astype(jnp.bfloat16)   # (kw*Cin, B*Wc), one cast
    out = jnp.dot(wflat, im2col, preferred_element_type=jnp.float32)
    return out + bias


# ----------------------------------------------------------------------------
# Single fused kernel: all residual layers + head in one invocation (no grid)
# ----------------------------------------------------------------------------
def _discriminator_kernel(x_ref, *refs, B, kw, padl, padr, group_size, layers_meta):
    """refs layout: per layer [w1, b1, w2, b2, (pm if sw > 1)], then wl_t, bl, o_ref."""
    o_ref = refs[-1]
    wl_ref, bl_ref = refs[-3], refs[-2]

    # Per-batch activation tiles (C, W), f32, resident in registers throughout.
    h_parts = [x_ref[b] for b in range(B)]

    ri = 0
    for (sw, residual_conv) in layers_meta:
        w1_ref, b1_ref, w2_ref, b2_ref = refs[ri:ri + 4]
        ri += 4
        pm_ref = None
        if sw > 1:
            pm_ref = refs[ri]
            ri += 1

        W = h_parts[0].shape[1]
        pad_x = [_reflect_pad_w(p, padl, padr) for p in h_parts]
        h1 = _conv1xkw_packed(pad_x, w1_ref[...], b1_ref[...], kw)   # (Cmid, B*W)
        h1 = jnp.where(h1 >= 0.0, h1, 0.01 * h1)                     # F.leaky_relu (0.01)
        h1_parts = [h1[:, b * W:(b + 1) * W] for b in range(B)]
        pad_h1 = [_reflect_pad_w(p, padl, padr) for p in h1_parts]

        if residual_conv:
            # conv2(pad(h1)) + conv2(pad(x)) == conv2_nobias(pad(h1)+pad(x)) + 2*b2
            # (reference applies conv2's bias in BOTH branches; pool(const)=const).
            pad_sum = [a + b_ for a, b_ in zip(pad_h1, pad_x)]
            h2 = _conv1xkw_packed(pad_sum, w2_ref[...], 2.0 * b2_ref[...], kw)
            if sw > 1:
                pooled = jnp.dot(h2, pm_ref[...], preferred_element_type=jnp.float32)
            else:
                pooled = h2
        else:
            # Reference takes this branch only with stride (1,1) (pool = identity)
            # when its quirky width==channels check passes; requires Cin == Cout.
            h2 = _conv1xkw_packed(pad_h1, w2_ref[...], b2_ref[...], kw)
            pooled = jnp.concatenate(h_parts, axis=1) + h2

        Wout = W // sw
        h_parts = [pooled[:, b * Wout:(b + 1) * Wout] for b in range(B)]

    # ---- head: relu -> minibatch stddev -> sum over channels (+stddev) -> linear
    relu_parts = [jnp.maximum(p, 0.0) for p in h_parts]              # (Cf, Wf) each
    G = group_size
    M = B // G
    # torch.reshape(x, (G, M, C, H, W)): batch b = g*M + m; stats over g, per m.
    stats = []
    for m in range(M):
        grp = [relu_parts[g * M + m] for g in range(G)]
        mean = grp[0]
        for p in grp[1:]:
            mean = mean + p
        mean = mean * (1.0 / G)
        var = None
        for p in grp:
            d = p - mean
            var = d * d if var is None else var + d * d
        var = var * (1.0 / G)
        std = jnp.sqrt(var + 1e-08)
        s = jnp.mean(std, axis=1, keepdims=True)                     # mean over W
        s = jnp.mean(s, axis=0, keepdims=True)                       # mean over C -> (1, 1)
        stats.append(s)
    rows = []
    for b in range(B):
        csum = jnp.sum(relu_parts[b], axis=0, keepdims=True)         # (1, Wf) channel sum
        rows.append(csum + stats[b % M])                             # + stddev feature chan
    feat = jnp.concatenate(rows, axis=0)                             # (B, Wf)
    out = jnp.dot(feat, wl_ref[...], preferred_element_type=jnp.float32) + bl_ref[...]
    o_ref[...] = out


# ----------------------------------------------------------------------------
# Parameter setup (plain-JAX glue)
# ----------------------------------------------------------------------------
def _xavier_uniform(key, shape):
    cout, cin, kh, kw = shape
    fan_in, fan_out = cin * kh * kw, cout * kh * kw
    bound = math.sqrt(6.0 / (fan_in + fan_out))
    return jax.random.uniform(key, shape, jnp.float32, -bound, bound)


def _spectral_normalize(w, n_iters=20, eps=1e-12):
    # TODO(synk): PyTorch spectral_norm runs one power-iteration per forward with
    # persistent u/v buffers; here it is applied once, deterministically, at setup.
    wm = w.reshape(w.shape[0], -1).astype(jnp.float32)
    u = jnp.ones((wm.shape[0],), jnp.float32)
    u = u / (jnp.linalg.norm(u) + eps)
    v = wm.T @ u
    v = v / (jnp.linalg.norm(v) + eps)
    for _ in range(n_iters):
        v = wm.T @ u
        v = v / (jnp.linalg.norm(v) + eps)
        u = wm @ v
        u = u / (jnp.linalg.norm(u) + eps)
    sigma = u @ (wm @ v)
    return w / sigma


def _pool_matrix(n_in, sw):
    """(n_in, n_in//sw) avg-pool matrix; block-diagonal over contiguous per-batch
    segments whose width is a multiple of sw (host-built constant)."""
    n_out = n_in // sw
    r = np.arange(n_in)[:, None]
    c = np.arange(n_out)[None, :]
    return jnp.asarray(((r // sw) == c).astype(np.float32) / float(sw))


# ----------------------------------------------------------------------------
# Discriminator
# ----------------------------------------------------------------------------
class DiscriminatorPallas:
    def __init__(self, config, d_model, key):
        self.config = config
        self.d_model = d_model
        self.num_classes = config['num_classes']
        self.strides = [tuple(config['strides'])] * config['num_layers']
        self.df_dim = config['df_dim']

        # GNNBaseModel dimension logic
        height_d, width_d = 1, 1
        for s in self.strides:
            height_d *= s[0]
            width_d *= s[1]
        self.c_h = int(1 / height_d)
        self.c_w = int(d_model / width_d)
        kh, kw = config['kernel_height'], config['kernel_width']
        if self.c_h < kh:
            kh = self.c_h
        elif self.c_w < kw:
            kw = self.c_w
        self.kernel = (kh, kw)
        dil = config['dilation_rate']
        eh, ew = (kh - 1) * dil, (kw - 1) * dil
        self.padding_dim = [ew // 2, ew - ew // 2, eh // 2, eh - eh // 2]
        assert all(s[0] == 1 for s in self.strides), "height-1 model needs height stride 1"
        assert kh == 1, "height-1 model requires kernel height 1"
        assert self.padding_dim[2] == 0 and self.padding_dim[3] == 0

        keys = jax.random.split(key, 2 * len(self.strides) + 2)
        ki = iter(range(len(keys)))

        hidden_dim = self.df_dim
        input_dim = self.num_classes
        widths = [d_model]
        self.layers = []
        for layer_id, (sh, sw) in enumerate(self.strides):
            hidden_dim = hidden_dim * sh
            w1 = _spectral_normalize(_xavier_uniform(keys[next(ki)], (input_dim, input_dim, kh, kw)))
            w2 = _spectral_normalize(_xavier_uniform(keys[next(ki)], (hidden_dim, input_dim, kh, kw)))
            # im2col-ready layout (Cout, kw*Cin): column index = tap*Cin + channel.
            w1f = jnp.transpose(w1[:, :, 0, :], (0, 2, 1)).reshape(input_dim, kw * input_dim)
            w2f = jnp.transpose(w2[:, :, 0, :], (0, 2, 1)).reshape(hidden_dim, kw * input_dim)
            # Reference quirk kept verbatim: `input_channels = h.size(dim=-1)` is the
            # WIDTH of h, compared against conv2's output channel count.
            residual_conv = (sh > 1) or (sw > 1) or (widths[-1] != hidden_dim)
            assert widths[-1] % sw == 0
            self.layers.append(dict(
                w1f=w1f.astype(jnp.bfloat16),
                b1=jnp.zeros((input_dim, 1), jnp.float32),     # init_weights: bias = 0
                w2f=w2f.astype(jnp.bfloat16),
                b2=jnp.zeros((hidden_dim, 1), jnp.float32),
                sw=sw, residual_conv=residual_conv))
            widths.append(widths[-1] // sw)
            input_dim = hidden_dim
        self.widths = widths
        assert widths[-1] == self.c_w

        # snlinear = spectral_norm(nn.Linear(c_w, 1))  (default torch Linear init)
        bound = 1.0 / math.sqrt(self.c_w)
        wl = jax.random.uniform(keys[next(ki)], (1, self.c_w), jnp.float32, -bound, bound)
        self.wl_t = _spectral_normalize(wl).T                         # (c_w, 1)
        self.bl = jax.random.uniform(keys[next(ki)], (1,), jnp.float32,
                                     -bound, bound).reshape(1, 1)

    def __call__(self, inp):
        # layout: NCHW with H == 1; squeezed internally to per-batch (C, W) tiles.
        B, C0, H, W = inp.shape
        assert H == 1 and C0 == self.num_classes and W == self.d_model
        group_size = min(4, B)
        assert B % group_size == 0, "minibatch-stddev needs batch divisible by group size"

        x = inp.reshape(B, C0, W).astype(jnp.float32)

        # NOTE: the reference's self-attention output at layer 1 is multiplied by a
        # hard-coded zero (attention_multiplier = torch.zeros(1, 1)), so h is exactly
        # unchanged; the block is omitted.  TODO(synk): add an in-kernel attention
        # path if the multiplier ever becomes learnable / nonzero.

        inputs = [x]
        layers_meta = []
        w = W
        for lp in self.layers:
            inputs += [lp['w1f'], lp['b1'], lp['w2f'], lp['b2']]
            if lp['sw'] > 1:
                inputs.append(_pool_matrix(B * w, lp['sw']))          # host-built constant
            layers_meta.append((lp['sw'], lp['residual_conv']))
            w = w // lp['sw']
        inputs += [self.wl_t, self.bl]

        kernel = functools.partial(
            _discriminator_kernel, B=B, kw=self.kernel[1],
            padl=self.padding_dim[0], padr=self.padding_dim[1],
            group_size=group_size, layers_meta=tuple(layers_meta))

        vmem = pl.BlockSpec(memory_space=pltpu.MemorySpace.VMEM)
        return pl.pallas_call(
            kernel,
            out_shape=jax.ShapeDtypeStruct((B, 1), jnp.float32),
            in_specs=[vmem] * len(inputs),
            out_specs=vmem,
            compiler_params=pltpu.CompilerParams(vmem_limit_bytes=_VMEM_LIMIT),
        )(*inputs)


# ----------------------------------------------------------------------------
if __name__ == "__main__":
    config = {
        'num_classes': 4,
        'strides': [1, 2],
        'num_layers': 2,
        'z_dim': 8,
        'gf_dim': 8,
        'df_dim': 4,
        'kernel_height': 3,
        'kernel_width': 3,
        'dilation_rate': 1,
    }
    d_model = 16

    key = jax.random.PRNGKey(0)
    pkey, xkey = jax.random.split(key)
    disc = DiscriminatorPallas(config, d_model, pkey)

    x = jax.random.normal(xkey, (2, config['num_classes'], 1, d_model), jnp.float32)
    fwd = jax.jit(disc.__call__)
    out = jax.block_until_ready(fwd(x))
    assert out.shape == (2, 1)
    assert bool(jnp.all(jnp.isfinite(out)))
    print("KERNEL_OK")
</pallas_src>

<mosaic_0001>
module attributes {stable_mosaic.version = 11 : i64} {
  func.func @_discriminator_kernel(%arg0: memref<2x4x16xf32, #tpu.memory_space<vmem>>, %arg1: memref<4x12xbf16, #tpu.memory_space<vmem>>, %arg2: memref<4x1xf32, #tpu.memory_space<vmem>>, %arg3: memref<4x12xbf16, #tpu.memory_space<vmem>>, %arg4: memref<4x1xf32, #tpu.memory_space<vmem>>, %arg5: memref<32x16xf32, #tpu.memory_space<vmem>>, %arg6: memref<4x12xbf16, #tpu.memory_space<vmem>>, %arg7: memref<4x1xf32, #tpu.memory_space<vmem>>, %arg8: memref<4x12xbf16, #tpu.memory_space<vmem>>, %arg9: memref<4x1xf32, #tpu.memory_space<vmem>>, %arg10: memref<16x8xf32, #tpu.memory_space<vmem>>, %arg11: memref<4x1xf32, #tpu.memory_space<vmem>>, %arg12: memref<1x1xf32, #tpu.memory_space<vmem>>, %arg13: memref<2x1xf32, #tpu.memory_space<vmem>>) attributes {dimension_semantics = [], scalar_prefetch = 0 : i64, scratch_operands = 0 : i64, tpu.core_type = #tpu.core_type<tc>} {
    %c0 = arith.constant 0 : index
    %c0_0 = arith.constant 0 : index
    %c0_1 = arith.constant 0 : index
    %0 = vector.load %arg0[%c0, %c0_0, %c0_1] : memref<2x4x16xf32, #tpu.memory_space<vmem>>, vector<1x4x16xf32>
    %1 = vector.shape_cast %0 : vector<1x4x16xf32> to vector<4x16xf32>
    %c1 = arith.constant 1 : index
    %c0_2 = arith.constant 0 : index
    %c0_3 = arith.constant 0 : index
    %2 = vector.load %arg0[%c1, %c0_2, %c0_3] : memref<2x4x16xf32, #tpu.memory_space<vmem>>, vector<1x4x16xf32>
    %3 = vector.shape_cast %2 : vector<1x4x16xf32> to vector<4x16xf32>
    %4 = vector.extract_strided_slice %1 {offsets = [0, 1], sizes = [4, 1], strides = [1, 1]} : vector<4x16xf32> to vector<4x1xf32>
    %5 = vector.extract_strided_slice %1 {offsets = [0, 14], sizes = [4, 1], strides = [1, 1]} : vector<4x16xf32> to vector<4x1xf32>
    %6 = tpu.concatenate %4, %1, %5 in 1 : vector<4x1xf32>, vector<4x16xf32>, vector<4x1xf32> -> vector<4x18xf32>
    %7 = vector.extract_strided_slice %3 {offsets = [0, 1], sizes = [4, 1], strides = [1, 1]} : vector<4x16xf32> to vector<4x1xf32>
    %8 = vector.extract_strided_slice %3 {offsets = [0, 14], sizes = [4, 1], strides = [1, 1]} : vector<4x16xf32> to vector<4x1xf32>
    %9 = tpu.concatenate %7, %3, %8 in 1 : vector<4x1xf32>, vector<4x16xf32>, vector<4x1xf32> -> vector<4x18xf32>
    %c0_4 = arith.constant 0 : index
    %c0_5 = arith.constant 0 : index
    %10 = vector.load %arg1[%c0_4, %c0_5] : memref<4x12xbf16, #tpu.memory_space<vmem>>, vector<4x12xbf16>
    %c0_6 = arith.constant 0 : index
    %c0_7 = arith.constant 0 : index
    %11 = vector.load %arg2[%c0_6, %c0_7] : memref<4x1xf32, #tpu.memory_space<vmem>>, vector<4x1xf32>
    %12 = vector.extract_strided_slice %6 {offsets = [0, 0], sizes = [4, 16], strides = [1, 1]} : vector<4x18xf32> to vector<4x16xf32>
    %13 = vector.extract_strided_slice %9 {offsets = [0, 0], sizes = [4, 16], strides = [1, 1]} : vector<4x18xf32> to vector<4x16xf32>
    %14 = tpu.concatenate %12, %13 in 1 : vector<4x16xf32>, vector<4x16xf32> -> vector<4x32xf32>
    %15 = vector.extract_strided_slice %6 {offsets = [0, 1], sizes = [4, 16], strides = [1, 1]} : vector<4x18xf32> to vector<4x16xf32>
    %16 = vector.extract_strided_slice %9 {offsets = [0, 1], sizes = [4, 16], strides = [1, 1]} : vector<4x18xf32> to vector<4x16xf32>
    %17 = tpu.concatenate %15, %16 in 1 : vector<4x16xf32>, vector<4x16xf32> -> vector<4x32xf32>
    %18 = vector.extract_strided_slice %6 {offsets = [0, 2], sizes = [4, 16], strides = [1, 1]} : vector<4x18xf32> to vector<4x16xf32>
    %19 = vector.extract_strided_slice %9 {offsets = [0, 2], sizes = [4, 16], strides = [1, 1]} : vector<4x18xf32> to vector<4x16xf32>
    %20 = tpu.concatenate %18, %19 in 1 : vector<4x16xf32>, vector<4x16xf32> -> vector<4x32xf32>
    %21 = tpu.concatenate %14, %17, %20 in 0 : vector<4x32xf32>, vector<4x32xf32>, vector<4x32xf32> -> vector<12x32xf32>
    %22 = arith.truncf %21 : vector<12x32xf32> to vector<12x32xbf16>
    %cst = arith.constant dense<0.000000e+00> : vector<4x32xf32>
    %23 = tpu.matmul %10, %22, %cst {dimension_numbers = #tpu.dot_dimension_numbers<[1], [0], [0], [1], [0, 0, 1, 1], [], []>} : vector<4x12xbf16>, vector<12x32xbf16>, vector<4x32xf32> -> vector<4x32xf32>
    %24 = vector.broadcast %11 : vector<4x1xf32> to vector<4x32xf32>
    %25 = arith.addf %23, %24 : vector<4x32xf32>
    %cst_8 = arith.constant 0.000000e+00 : f32
    %26 = vector.broadcast %cst_8 : f32 to vector<4x32xf32>
    %27 = arith.cmpf oge, %25, %26 : vector<4x32xf32>
    %cst_9 = arith.constant 0.00999999977 : f32
    %28 = vector.broadcast %cst_9 : f32 to vector<4x32xf32>
    %29 = arith.mulf %28, %25 : vector<4x32xf32>
    %30 = arith.select %27, %25, %29 : vector<4x32xi1>, vector<4x32xf32>
    %31 = vector.extract_strided_slice %30 {offsets = [0, 0], sizes = [4, 16], strides = [1, 1]} : vector<4x32xf32> to vector<4x16xf32>
    %32 = vector.extract_strided_slice %30 {offsets = [0, 16], sizes = [4, 16], strides = [1, 1]} : vector<4x32xf32> to vector<4x16xf32>
    %33 = vector.extract_strided_slice %31 {offsets = [0, 1], sizes = [4, 1], strides = [1, 1]} : vector<4x16xf32> to vector<4x1xf32>
    %34 = vector.extract_strided_slice %31 {offsets = [0, 14], sizes = [4, 1], strides = [1, 1]} : vector<4x16xf32> to vector<4x1xf32>
    %35 = tpu.concatenate %33, %31, %34 in 1 : vector<4x1xf32>, vector<4x16xf32>, vector<4x1xf32> -> vector<4x18xf32>
    %36 = vector.extract_strided_slice %32 {offsets = [0, 1], sizes = [4, 1], strides = [1, 1]} : vector<4x16xf32> to vector<4x1xf32>
    %37 = vector.extract_strided_slice %32 {offsets = [0, 14], sizes = [4, 1], strides = [1, 1]} : vector<4x16xf32> to vector<4x1xf32>
    %38 = tpu.concatenate %36, %32, %37 in 1 : vector<4x1xf32>, vector<4x16xf32>, vector<4x1xf32> -> vector<4x18xf32>
    %39 = arith.addf %35, %6 : vector<4x18xf32>
    %40 = arith.addf %38, %9 : vector<4x18xf32>
    %c0_10 = arith.constant 0 : index
    %c0_11 = arith.constant 0 : index
    %41 = vector.load %arg3[%c0_10, %c0_11] : memref<4x12xbf16, #tpu.memory_space<vmem>>, vector<4x12xbf16>
    %c0_12 = arith.constant 0 : index
    %c0_13 = arith.constant 0 : index
    %42 = vector.load %arg4[%c0_12, %c0_13] : memref<4x1xf32, #tpu.memory_space<vmem>>, vector<4x1xf32>
    %cst_14 = arith.constant 2.000000e+00 : f32
    %43 = vector.broadcast %cst_14 : f32 to vector<4x1xf32>
    %44 = arith.mulf %43, %42 : vector<4x1xf32>
    %45 = vector.extract_strided_slice %39 {offsets = [0, 0], sizes = [4, 16], strides = [1, 1]} : vector<4x18xf32> to vector<4x16xf32>
    %46 = vector.extract_strided_slice %40 {offsets = [0, 0], sizes = [4, 16], strides = [1, 1]} : vector<4x18xf32> to vector<4x16xf32>
    %47 = tpu.concatenate %45, %46 in 1 : vector<4x16xf32>, vector<4x16xf32> -> vector<4x32xf32>
    %48 = vector.extract_strided_slice %39 {offsets = [0, 1], sizes = [4, 16], strides = [1, 1]} : vector<4x18xf32> to vector<4x16xf32>
    %49 = vector.extract_strided_slice %40 {offsets = [0, 1], sizes = [4, 16], strides = [1, 1]} : vector<4x18xf32> to vector<4x16xf32>
    %50 = tpu.concatenate %48, %49 in 1 : vector<4x16xf32>, vector<4x16xf32> -> vector<4x32xf32>
    %51 = vector.extract_strided_slice %39 {offsets = [0, 2], sizes = [4, 16], strides = [1, 1]} : vector<4x18xf32> to vector<4x16xf32>
    %52 = vector.extract_strided_slice %40 {offsets = [0, 2], sizes = [4, 16], strides = [1, 1]} : vector<4x18xf32> to vector<4x16xf32>
    %53 = tpu.concatenate %51, %52 in 1 : vector<4x16xf32>, vector<4x16xf32> -> vector<4x32xf32>
    %54 = tpu.concatenate %47, %50, %53 in 0 : vector<4x32xf32>, vector<4x32xf32>, vector<4x32xf32> -> vector<12x32xf32>
    %55 = arith.truncf %54 : vector<12x32xf32> to vector<12x32xbf16>
    %cst_15 = arith.constant dense<0.000000e+00> : vector<4x32xf32>
    %56 = tpu.matmul %41, %55, %cst_15 {dimension_numbers = #tpu.dot_dimension_numbers<[1], [0], [0], [1], [0, 0, 1, 1], [], []>} : vector<4x12xbf16>, vector<12x32xbf16>, vector<4x32xf32> -> vector<4x32xf32>
    %57 = vector.broadcast %44 : vector<4x1xf32> to vector<4x32xf32>
    %58 = arith.addf %56, %57 : vector<4x32xf32>
    %c0_16 = arith.constant 0 : index
    %c0_17 = arith.constant 0 : index
    %59 = vector.load %arg5[%c0_16, %c0_17] : memref<32x16xf32, #tpu.memory_space<vmem>>, vector<32x16xf32>
    %cst_18 = arith.constant dense<0.000000e+00> : vector<4x16xf32>
    %60 = tpu.matmul %58, %59, %cst_18 {dimension_numbers = #tpu.dot_dimension_numbers<[1], [0], [0], [1], [0, 0, 1, 1], [], []>} : vector<4x32xf32>, vector<32x16xf32>, vector<4x16xf32> -> vector<4x16xf32>
    %61 = vector.extract_strided_slice %60 {offsets = [0, 0], sizes = [4, 8], strides = [1, 1]} : vector<4x16xf32> to vector<4x8xf32>
    %62 = vector.extract_strided_slice %60 {offsets = [0, 8], sizes = [4, 8], strides = [1, 1]} : vector<4x16xf32> to vector<4x8xf32>
    %63 = vector.extract_strided_slice %61 {offsets = [0, 1], sizes = [4, 1], strides = [1, 1]} : vector<4x8xf32> to vector<4x1xf32>
    %64 = vector.extract_strided_slice %61 {offsets = [0, 6], sizes = [4, 1], strides = [1, 1]} : vector<4x8xf32> to vector<4x1xf32>
    %65 = tpu.concatenate %63, %61, %64 in 1 : vector<4x1xf32>, vector<4x8xf32>, vector<4x1xf32> -> vector<4x10xf32>
    %66 = vector.extract_strided_slice %62 {offsets = [0, 1], sizes = [4, 1], strides = [1, 1]} : vector<4x8xf32> to vector<4x1xf32>
    %67 = vector.extract_strided_slice %62 {offsets = [0, 6], sizes = [4, 1], strides = [1, 1]} : vector<4x8xf32> to vector<4x1xf32>
    %68 = tpu.concatenate %66, %62, %67 in 1 : vector<4x1xf32>, vector<4x8xf32>, vector<4x1xf32> -> vector<4x10xf32>
    %c0_19 = arith.constant 0 : index
    %c0_20 = arith.constant 0 : index
    %69 = vector.load %arg6[%c0_19, %c0_20] : memref<4x12xbf16, #tpu.memory_space<vmem>>, vector<4x12xbf16>
    %c0_21 = arith.constant 0 : index
    %c0_22 = arith.constant 0 : index
    %70 = vector.load %arg7[%c0_21, %c0_22] : memref<4x1xf32, #tpu.memory_space<vmem>>, vector<4x1xf32>
    %71 = vector.extract_strided_slice %65 {offsets = [0, 0], sizes = [4, 8], strides = [1, 1]} : vector<4x10xf32> to vector<4x8xf32>
    %72 = vector.extract_strided_slice %68 {offsets = [0, 0], sizes = [4, 8], strides = [1, 1]} : vector<4x10xf32> to vector<4x8xf32>
    %73 = tpu.concatenate %71, %72 in 1 : vector<4x8xf32>, vector<4x8xf32> -> vector<4x16xf32>
    %74 = vector.extract_strided_slice %65 {offsets = [0, 1], sizes = [4, 8], strides = [1, 1]} : vector<4x10xf32> to vector<4x8xf32>
    %75 = vector.extract_strided_slice %68 {offsets = [0, 1], sizes = [4, 8], strides = [1, 1]} : vector<4x10xf32> to vector<4x8xf32>
    %76 = tpu.concatenate %74, %75 in 1 : vector<4x8xf32>, vector<4x8xf32> -> vector<4x16xf32>
    %77 = vector.extract_strided_slice %65 {offsets = [0, 2], sizes = [4, 8], strides = [1, 1]} : vector<4x10xf32> to vector<4x8xf32>
    %78 = vector.extract_strided_slice %68 {offsets = [0, 2], sizes = [4, 8], strides = [1, 1]} : vector<4x10xf32> to vector<4x8xf32>
    %79 = tpu.concatenate %77, %78 in 1 : vector<4x8xf32>, vector<4x8xf32> -> vector<4x16xf32>
    %80 = tpu.concatenate %73, %76, %79 in 0 : vector<4x16xf32>, vector<4x16xf32>, vector<4x16xf32> -> vector<12x16xf32>
    %81 = arith.truncf %80 : vector<12x16xf32> to vector<12x16xbf16>
    %cst_23 = arith.constant dense<0.000000e+00> : vector<4x16xf32>
    %82 = tpu.matmul %69, %81, %cst_23 {dimension_numbers = #tpu.dot_dimension_numbers<[1], [0], [0], [1], [0, 0, 1, 1], [], []>} : vector<4x12xbf16>, vector<12x16xbf16>, vector<4x16xf32> -> vector<4x16xf32>
    %83 = vector.broadcast %70 : vector<4x1xf32> to vector<4x16xf32>
    %84 = arith.addf %82, %83 : vector<4x16xf32>
    %cst_24 = arith.constant 0.000000e+00 : f32
    %85 = vector.broadcast %cst_24 : f32 to vector<4x16xf32>
    %86 = arith.cmpf oge, %84, %85 : vector<4x16xf32>
    %cst_25 = arith.constant 0.00999999977 : f32
    %87 = vector.broadcast %cst_25 : f32 to vector<4x16xf32>
    %88 = arith.mulf %87, %84 : vector<4x16xf32>
    %89 = arith.select %86, %84, %88 : vector<4x16xi1>, vector<4x16xf32>
    %90 = vector.extract_strided_slice %89 {offsets = [0, 0], sizes = [4, 8], strides = [1, 1]} : vector<4x16xf32> to vector<4x8xf32>
    %91 = vector.extract_strided_slice %89 {offsets = [0, 8], sizes = [4, 8], strides = [1, 1]} : vector<4x16xf32> to vector<4x8xf32>
    %92 = vector.extract_strided_slice %90 {offsets = [0, 1], sizes = [4, 1], strides = [1, 1]} : vector<4x8xf32> to vector<4x1xf32>
    %93 = vector.extract_strided_slice %90 {offsets = [0, 6], sizes = [4, 1], strides = [1, 1]} : vector<4x8xf32> to vector<4x1xf32>
    %94 = tpu.concatenate %92, %90, %93 in 1 : vector<4x1xf32>, vector<4x8xf32>, vector<4x1xf32> -> vector<4x10xf32>
    %95 = vector.extract_strided_slice %91 {offsets = [0, 1], sizes = [4, 1], strides = [1, 1]} : vector<4x8xf32> to vector<4x1xf32>
    %96 = vector.extract_strided_slice %91 {offsets = [0, 6], sizes = [4, 1], strides = [1, 1]} : vector<4x8xf32> to vector<4x1xf32>
    %97 = tpu.concatenate %95, %91, %96 in 1 : vector<4x1xf32>, vector<4x8xf32>, vector<4x1xf32> -> vector<4x10xf32>
    %98 = arith.addf %94, %65 : vector<4x10xf32>
    %99 = arith.addf %97, %68 : vector<4x10xf32>
    %c0_26 = arith.constant 0 : index
    %c0_27 = arith.constant 0 : index
    %100 = vector.load %arg8[%c0_26, %c0_27] : memref<4x12xbf16, #tpu.memory_space<vmem>>, vector<4x12xbf16>
    %c0_28 = arith.constant 0 : index
    %c0_29 = arith.constant 0 : index
    %101 = vector.load %arg9[%c0_28, %c0_29] : memref<4x1xf32, #tpu.memory_space<vmem>>, vector<4x1xf32>
    %cst_30 = arith.constant 2.000000e+00 : f32
    %102 = vector.broadcast %cst_30 : f32 to vector<4x1xf32>
    %103 = arith.mulf %102, %101 : vector<4x1xf32>
    %104 = vector.extract_strided_slice %98 {offsets = [0, 0], sizes = [4, 8], strides = [1, 1]} : vector<4x10xf32> to vector<4x8xf32>
    %105 = vector.extract_strided_slice %99 {offsets = [0, 0], sizes = [4, 8], strides = [1, 1]} : vector<4x10xf32> to vector<4x8xf32>
    %106 = tpu.concatenate %104, %105 in 1 : vector<4x8xf32>, vector<4x8xf32> -> vector<4x16xf32>
    %107 = vector.extract_strided_slice %98 {offsets = [0, 1], sizes = [4, 8], strides = [1, 1]} : vector<4x10xf32> to vector<4x8xf32>
    %108 = vector.extract_strided_slice %99 {offsets = [0, 1], sizes = [4, 8], strides = [1, 1]} : vector<4x10xf32> to vector<4x8xf32>
    %109 = tpu.concatenate %107, %108 in 1 : vector<4x8xf32>, vector<4x8xf32> -> vector<4x16xf32>
    %110 = vector.extract_strided_slice %98 {offsets = [0, 2], sizes = [4, 8], strides = [1, 1]} : vector<4x10xf32> to vector<4x8xf32>
    %111 = vector.extract_strided_slice %99 {offsets = [0, 2], sizes = [4, 8], strides = [1, 1]} : vector<4x10xf32> to vector<4x8xf32>
    %112 = tpu.concatenate %110, %111 in 1 : vector<4x8xf32>, vector<4x8xf32> -> vector<4x16xf32>
    %113 = tpu.concatenate %106, %109, %112 in 0 : vector<4x16xf32>, vector<4x16xf32>, vector<4x16xf32> -> vector<12x16xf32>
    %114 = arith.truncf %113 : vector<12x16xf32> to vector<12x16xbf16>
    %cst_31 = arith.constant dense<0.000000e+00> : vector<4x16xf32>
    %115 = tpu.matmul %100, %114, %cst_31 {dimension_numbers = #tpu.dot_dimension_numbers<[1], [0], [0], [1], [0, 0, 1, 1], [], []>} : vector<4x12xbf16>, vector<12x16xbf16>, vector<4x16xf32> -> vector<4x16xf32>
    %116 = vector.broadcast %103 : vector<4x1xf32> to vector<4x16xf32>
    %117 = arith.addf %115, %116 : vector<4x16xf32>
    %c0_32 = arith.constant 0 : index
    %c0_33 = arith.constant 0 : index
    %118 = vector.load %arg10[%c0_32, %c0_33] : memref<16x8xf32, #tpu.memory_space<vmem>>, vector<16x8xf32>
    %cst_34 = arith.constant dense<0.000000e+00> : vector<4x8xf32>
    %119 = tpu.matmul %117, %118, %cst_34 {dimension_numbers = #tpu.dot_dimension_numbers<[1], [0], [0], [1], [0, 0, 1, 1], [], []>} : vector<4x16xf32>, vector<16x8xf32>, vector<4x8xf32> -> vector<4x8xf32>
    %120 = vector.extract_strided_slice %119 {offsets = [0, 0], sizes = [4, 4], strides = [1, 1]} : vector<4x8xf32> to vector<4x4xf32>
    %121 = vector.extract_strided_slice %119 {offsets = [0, 4], sizes = [4, 4], strides = [1, 1]} : vector<4x8xf32> to vector<4x4xf32>
    %cst_35 = arith.constant 0.000000e+00 : f32
    %122 = vector.broadcast %cst_35 : f32 to vector<4x4xf32>
    %123 = arith.maximumf %120, %122 : vector<4x4xf32>
    %cst_36 = arith.constant 0.000000e+00 : f32
    %124 = vector.broadcast %cst_36 : f32 to vector<4x4xf32>
    %125 = arith.maximumf %121, %124 : vector<4x4xf32>
    %126 = arith.addf %123, %125 : vector<4x4xf32>
    %cst_37 = arith.constant 5.000000e-01 : f32
    %127 = vector.broadcast %cst_37 : f32 to vector<4x4xf32>
    %128 = arith.mulf %126, %127 : vector<4x4xf32>
    %129 = arith.subf %123, %128 : vector<4x4xf32>
    %130 = arith.mulf %129, %129 : vector<4x4xf32>
    %131 = arith.subf %125, %128 : vector<4x4xf32>
    %132 = arith.mulf %131, %131 : vector<4x4xf32>
    %133 = arith.addf %130, %132 : vector<4x4xf32>
    %cst_38 = arith.constant 5.000000e-01 : f32
    %134 = vector.broadcast %cst_38 : f32 to vector<4x4xf32>
    %135 = arith.mulf %133, %134 : vector<4x4xf32>
    %cst_39 = arith.constant 9.99999993E-9 : f32
    %136 = vector.broadcast %cst_39 : f32 to vector<4x4xf32>
    %137 = arith.addf %135, %136 : vector<4x4xf32>
    %138 = math.sqrt %137 : vector<4x4xf32>
    %cst_40 = arith.constant dense<0.000000e+00> : vector<4xf32>
    %139 = vector.multi_reduction <add>, %138, %cst_40 [1] : vector<4x4xf32> to vector<4xf32>
    %140 = vector.shape_cast %139 : vector<4xf32> to vector<4x1xf32>
    %cst_41 = arith.constant 4.000000e+00 : f32
    %141 = vector.broadcast %cst_41 : f32 to vector<4x1xf32>
    %142 = arith.divf %140, %141 : vector<4x1xf32>
    %cst_42 = arith.constant dense<0.000000e+00> : vector<1xf32>
    %143 = vector.multi_reduction <add>, %142, %cst_42 [0] : vector<4x1xf32> to vector<1xf32>
    %144 = vector.shape_cast %143 : vector<1xf32> to vector<1x1xf32>
    %cst_43 = arith.constant 4.000000e+00 : f32
    %145 = vector.broadcast %cst_43 : f32 to vector<1x1xf32>
    %146 = arith.divf %144, %145 : vector<1x1xf32>
    %cst_44 = arith.constant dense<0.000000e+00> : vector<4xf32>
    %147 = vector.multi_reduction <add>, %123, %cst_44 [0] : vector<4x4xf32> to vector<4xf32>
    %148 = vector.shape_cast %147 : vector<4xf32> to vector<1x4xf32>
    %149 = vector.broadcast %146 : vector<1x1xf32> to vector<1x4xf32>
    %150 = arith.addf %148, %149 : vector<1x4xf32>
    %cst_45 = arith.constant dense<0.000000e+00> : vector<4xf32>
    %151 = vector.multi_reduction <add>, %125, %cst_45 [0] : vector<4x4xf32> to vector<4xf32>
    %152 = vector.shape_cast %151 : vector<4xf32> to vector<1x4xf32>
    %153 = vector.broadcast %146 : vector<1x1xf32> to vector<1x4xf32>
    %154 = arith.addf %152, %153 : vector<1x4xf32>
    %155 = tpu.concatenate %150, %154 in 0 : vector<1x4xf32>, vector<1x4xf32> -> vector<2x4xf32>
    %c0_46 = arith.constant 0 : index
    %c0_47 = arith.constant 0 : index
    %156 = vector.load %arg11[%c0_46, %c0_47] : memref<4x1xf32, #tpu.memory_space<vmem>>, vector<4x1xf32>
    %cst_48 = arith.constant dense<0.000000e+00> : vector<2x1xf32>
    %157 = tpu.matmul %155, %156, %cst_48 {dimension_numbers = #tpu.dot_dimension_numbers<[1], [0], [0], [1], [0, 0, 1, 1], [], []>} : vector<2x4xf32>, vector<4x1xf32>, vector<2x1xf32> -> vector<2x1xf32>
    %c0_49 = arith.constant 0 : index
    %c0_50 = arith.constant 0 : index
    %158 = vector.load %arg12[%c0_49, %c0_50] : memref<1x1xf32, #tpu.memory_space<vmem>>, vector<1x1xf32>
    %159 = vector.broadcast %158 : vector<1x1xf32> to vector<2x1xf32>
    %160 = arith.addf %157, %159 : vector<2x1xf32>
    %c0_51 = arith.constant 0 : index
    %c0_52 = arith.constant 0 : index
    %161 = vector.load %arg13[%c0_51, %c0_52] : memref<2x1xf32, #tpu.memory_space<vmem>>, vector<2x1xf32>
    tpu.vector_store %arg13[%c0_51, %c0_52], %160 {strides = array<i32>} : memref<2x1xf32, #tpu.memory_space<vmem>>, vector<2x1xf32>,
    return
  }
}

</mosaic_0001>

<bundles_post_ra>
// kernel: a_call__.1
= control target key start
LH: loop header
LB: loop body
LE: loop exit
PB: predicated region body
PF: predicated region fallthrough
CT: control target
= control target key end

     0   :  { %s1312_s0 = inlined_call_operand.hbm [shape: f32[2,4,16], index: 0, kind: input, shape index: {}]   ;;  %s1313_s1 = inlined_call_operand.hbm [shape: bf16[4,12], index: 1, kind: input, shape index: {}]   ;;  %s1314_s2 = inlined_call_operand.vmem [shape: f32[4,1], index: 2, kind: input, shape index: {}, may-alias: {2,4,7,9}]   ;;  %s1315_s3 = inlined_call_operand.vmem [shape: bf16[4,12], index: 3, kind: input, shape index: {}]   ;;  %s1316_s4 = inlined_call_operand.vmem [shape: f32[4,1], index: 4, kind: input, shape index: {}, may-alias: {2,4,7,9}]   ;;  %s1317_s5 = inlined_call_operand.hbm [shape: f32[32,16], index: 5, kind: input, shape index: {}]   ;;  %s1318_s6 = inlined_call_operand.vmem [shape: bf16[4,12], index: 6, kind: input, shape index: {}]   ;;  %s1319_s7 = inlined_call_operand.vmem [shape: f32[4,1], index: 7, kind: input, shape index: {}, may-alias: {2,4,7,9}]   ;;  %s1320_s8 = inlined_call_operand.vmem [shape: bf16[4,12], index: 8, kind: input, shape index: {}]   ;;  %s1321_s9 = inlined_call_operand.vmem [shape: f32[4,1], index: 9, kind: input, shape index: {}, may-alias: {2,4,7,9}]   ;;  %s1322_s10 = inlined_call_operand.vmem [shape: f32[16,8], index: 10, kind: input, shape index: {}]   ;;  %s1323_s11 = inlined_call_operand.vmem [shape: f32[4,1], index: 11, kind: input, shape index: {}]   ;;  %s1324_s12 = inlined_call_operand.<no memory space> [shape: f32[1,1], index: 12, kind: input, shape index: {}]   ;;  %s1325_s13 = inlined_call_operand.vmem [shape: f32[2,1], index: 13, kind: output, shape index: {}]  }
   0x1   :  { %v18_v0 = vstv %s1324_s12 }
   0x2   :  { %19 = vst [vmem:[#allocation2] sm:$0x1] %v18_v0 }
   0x3   :  { %20 = vsyncpa [#allocation4], 0 }
   0x4   :  { %21 = vsyncpa [#allocation6], 0  ;;  %s1010_s27 = smov [#allocation5]   ;;  %s1011_s29 = smov [#allocation3]  }
   0x5   :  { %s40_s28 = sshll.u32 %s1010_s27, 4  ;;  %s27_s30 = sshll.u32 %s1011_s29, 4  ;;  %s41_s28 = int_to_ptr.vmem [resolvable:$true] %s40_s28  ;;  %s1110_s30 = int_to_ptr.vmem [resolvable:$true] %s27_s30 }
   0x6   :  { %s940_s16 = scalar_lea.hbm %s1313_s1, 32 }
   0x7   :  { %p941_p0 = scmp.ne.s32.totalorder %s1313_s1, %s940_s16  ;;  %p944_p1 = scmp.lt.u32.totalorder %s940_s16, %s1313_s1 }
   0x9   :  { %p946_p2 = pnand %p944_p1, %p941_p0 }
   0xb   :  { %949 = shalt.err (!%p946_p2)
}
   0xc   :  { %s950_s20 = scalar_lea.vmem %s41_s28, 32  ;;  %p955_p4 = scmp.lt.s32.totalorder %s41_s28, %s41_s28 }
   0xd   :  { %p951_p3 = scmp.ne.s32.totalorder %s41_s28, %s950_s20  ;;  %p956_p5 = scmp.lt.s32.totalorder %s950_s20, %s950_s20 }
   0xf   :  { %p957_p6 = por %p956_p5, %p955_p4 }
  0x11   :  { %p958_p7 = pnand %p957_p6, %p951_p3 }
  0x13   :  { %961 = shalt.err (!%p958_p7)
}
  0x14   :  { %43 = dma.hbm_to_vmem [thread:$0]  %s1313_s1, 32, %s41_s28, [#allocation6]  }
  0x15   :  { %s962_s25 = scalar_lea.hbm %s1312_s0, 128 }
  0x16   :  { %p963_p8 = scmp.ne.s32.totalorder %s1312_s0, %s962_s25  ;;  %p966_p9 = scmp.lt.u32.totalorder %s962_s25, %s1312_s0 }
  0x18   :  { %p968_p10 = pnand %p966_p9, %p963_p8 }
  0x1a   :  { %971 = shalt.err (!%p968_p10)
}
  0x1b   :  { %s972_s15 = scalar_lea.vmem %s1110_s30, 128  ;;  %p977_p12 = scmp.lt.s32.totalorder %s1110_s30, %s1110_s30 }
  0x1c   :  { %p973_p11 = scmp.ne.s32.totalorder %s1110_s30, %s972_s15  ;;  %p978_p13 = scmp.lt.s32.totalorder %s972_s15, %s972_s15 }
  0x1e   :  { %p979_p0 = por %p978_p13, %p977_p12 }
  0x20   :  { %p980_p1 = pnand %p979_p0, %p973_p11 }
  0x22   :  { %983 = shalt.err (!%p980_p1)
}
  0x23   :  { %s1012_s1 = smov 64   ;;  %s1013_s28 = smov 4  }
  0x24   :  { %33 = dma.hbm_to_vmem [thread:$0]  %s1312_s0, 128, %s1110_s30, [#allocation4], %s1012_s1, %s1012_s1, %s1013_s28  }
  0x25   :  { %s1014_s18 = smov [#allocation7]   ;;  %s984_s21 = scalar_lea.hbm %s1317_s5, 512 }
  0x26   :  { %s55_s19 = sshll.u32 %s1014_s18, 4  ;;  %p985_p2 = scmp.ne.s32.totalorder %s1317_s5, %s984_s21  ;;  %s56_s19 = int_to_ptr.vmem [resolvable:$true] %s55_s19 }
  0x27   :  { %p988_p3 = scmp.lt.u32.totalorder %s984_s21, %s1317_s5 }
  0x29   :  { %p990_p4 = pnand %p988_p3, %p985_p2 }
  0x2b   :  { %993 = shalt.err (!%p990_p4)
}
  0x2c   :  { %s994_s26 = scalar_lea.vmem %s56_s19, 512  ;;  %p999_p6 = scmp.lt.s32.totalorder %s56_s19, %s56_s19 }
  0x2d   :  { %p995_p5 = scmp.ne.s32.totalorder %s56_s19, %s994_s26  ;;  %p1000_p7 = scmp.lt.s32.totalorder %s994_s26, %s994_s26 }
  0x2f   :  { %p1001_p8 = por %p1000_p7, %p999_p6 }
  0x31   :  { %p1002_p9 = pnand %p1001_p8, %p995_p5 }
  0x33   :  { %1005 = shalt.err (!%p1002_p9)
}
  0x34   :  { %s1015_s0 = smov 128   ;;  %s1016_s30 = smov 8  }
  0x35   :  { %61 = dma.hbm_to_vmem [thread:$0]  %s1317_s5, 512, %s56_s19, [#allocation6], %s1015_s0, %s1015_s0, %s1016_s30  }
  0x36   :  { %1006 = dma.done.wait [#allocation4], 128  }
  0x37   :  { %1007 = vsyncadd [#allocation4], 4294967168 }
  0x38   :  { %1008 = dma.done.wait [#allocation6], 544  }
  0x39   :  { %1009 = vsyncadd [#allocation6], 4294966752  ;;  %v88_v1 = vld [vmem:[#allocation3 + $0x4] sm:$0xf]  ;;  %v86_v2 = vld [vmem:[#allocation3] sm:$0xf] }
  0x3a   :  { %s1017_s14 = smov 127   ;;  %s1018_s15 = smov 1   ;;  %vm99_vm0 = vcmask 7168   ;;  %vm101_vm1 = vcmask 138240   ;;  %v1020_v7 = vmov 0.0   ;;  %vm1022_vm2 = vmmov 0  }
  0x3b   :  { %104 = vrot.lane.b32.xlu1 %v88_v1, %s1017_s14  ;;  %90 = vrot.lane.b32.xlu0 %v86_v2, %s1017_s14  ;;  %s1019_s1 = smov 3   ;;  %s1021_s5 = smov 15   ;;  %v1023_v14 = vmov 0   ;;  %v116_v15 = vld [vmem:[%s1314_s2] sm:$0xf]  ;;  %vm121_vm3 = vcmask 130048  }
  0x3c   :  { %853 = vmatprep.subr.bf16.mxu0 %v1020_v7  ;;  %859 = vmatprep.subr.bf16.mxu1 %v1020_v7  ;;  %s1024_s16 = smov 126   ;;  %s1025_s17 = smov 16   ;;  %vm141_vm4 = vcmask 1043456   ;;  %vm153_vm5 = vcmask 1045504   ;;  %v115_v28 = vld [vmem:[#allocation5] sm:$0x3] }
  0x3d   :  { %855 = vmatprep.mubr.msk.bf16.mxu0 %vm1022_vm2, %v1020_v7  ;;  %861 = vmatprep.mubr.msk.bf16.mxu1 %vm1022_vm2, %v1020_v7  ;;  %s1026_s12 = smov 14   ;;  %vm149_vm6 = vcmask 97280   ;;  %s1027_s2 = smov 113   ;;  %v226_v49 = vld [vmem:[%s1316_s4] sm:$0xf]  ;;  %v304_v51 = vld [vmem:[#allocation7] sm:$0xff] }
  0x3e   :  { %936 = vset.pattern.permute.xlu1 %v1023_v14  ;;  %937 = vset.pattern.permute.xlu0 %v1023_v14  ;;  %s1028_s20 = smov 111   ;;  %s1029_s21 = smov 115   ;;  %v227_v50 = vmul.f32 2.0, %v226_v49  ;;  %v305_v52 = vld [vmem:[#allocation7 + $0x8] sm:$0xff]  ;;  %v1030_v54 = vmov 0.0|0.0   ;;  %vm308_vm8 = vcmask 261120  }
  0x3f   :  { %107 = vrot.lane.b32.xlu1 %v88_v1, %s1018_s15  ;;  %93 = vrot.lane.b32.xlu0 %v86_v2, %s1018_s15  ;;  %v901_v53 = vpack.c.bf16 %v305_v52, %v304_v51  ;;  %s1032_s25 = smov 119   ;;  %s1033_s26 = smov 123   ;;  %vm393_vm9 = vcmask 72704   ;;  %vm412_vm10 = vcmask 64512   ;;  %vm696_vm14 = vcmask 27648  }
  0x40   :  { %s1034_s0 = smov 7   ;;  %vm718_vm15 = vcmask 60448  }
  0x43   :  { %110 = vrot.lane.b32.xlu1 %v88_v1, %s1019_s1  ;;  %96 = vrot.lane.b32.xlu0 %v86_v2, %s1019_s1 }
  0xad   :  { %v105_v3 = vpop.permute.xlu1 %104  ;;  %v91_v4 = vpop.permute.xlu0 %90 }
  0xb1   :  { %v108_v5 = vpop.permute.xlu1 %107  ;;  %v94_v6 = vpop.permute.xlu0 %93 }
  0xb2   :  { %v113_v8 = vsel %vm99_vm0, %v105_v3, %v108_v5  ;;  %v100_v9 = vsel %vm99_vm0, %v91_v4, %v94_v6  ;;  %v225_v3 = vld [vmem:[%s1315_s3] sm:$0x3]  ;;  %v307_v5 = vld [vmem:[#allocation7 + $0x18] sm:$0xff]  ;;  %s1031_s3 = smov 121  }
  0xb3   :  { %v306_v4 = vld [vmem:[#allocation7 + $0x10] sm:$0xff] }
  0xb4   :  { %v904_v6 = vpack.c.bf16 %v307_v5, %v306_v4 }
  0xb5   :  { %v111_v10 = vpop.permute.xlu1 %110  ;;  %v97_v11 = vpop.permute.xlu0 %96 }
  0xb6   :  { %v1166_v12 = vsel %vm101_vm1, %v113_v8, %v111_v10  ;;  %v1169_v13 = vsel %vm101_vm1, %v100_v9, %v97_v11 }
  0xb7   :  { %127 = vrot.lane.b32.xlu1 %v1166_v12, %s1021_s5  ;;  %124 = vrot.lane.b32.xlu0 %v1169_v13, %s1017_s14 }
  0xbb   :  { %131 = vrot.lane.b32.xlu1 %v1169_v13, %s1024_s16  ;;  %118 = vrot.lane.b32.xlu0 %v1166_v12, %s1025_s17 }
  0xbf   :  { %134 = vrot.lane.b32.xlu0 %v1166_v12, %s1026_s12  ;;  %146 = vperm.xlu1 %936, %v116_v15  }
 0x129   :  { %v125_v16 = vpop.permute.xlu0 %124  ;;  %v128_v17 = vpop.permute.xlu1 %127 }
 0x12a   :  { %v130_v18 = vsel %vm121_vm3, %v125_v16, %v128_v17 }
 0x12b   :  { %v139_v21 = vrot.slane %v130_v18, 4 }
 0x12d   :  { %v119_v19 = vpop.permute.xlu0 %118  ;;  %v132_v22 = vpop.permute.xlu1 %131 }
 0x12e   :  { %v122_v20 = vsel %vm121_vm3, %v1169_v13, %v119_v19 }
 0x12f   :  { %v142_v25 = vsel %vm141_vm4, %v122_v20, %v139_v21 }
 0x131   :  { %v135_v23 = vpop.permute.xlu0 %134 }
 0x132   :  { %v137_v24 = vsel %vm121_vm3, %v132_v22, %v135_v23 }
 0x133   :  { %v143_v26 = vpack.c.bf16 %v137_v24, %v142_v25 }
 0x135   :  { %v155_v27 = vsel %vm153_vm5, %v143_v26, 0  ;;  %v407_v26 = vld [vmem:[%s1319_s7] sm:$0xf] }
 0x136   :  { %854 = vmatpush3.bf16.msra.mxu0 %v155_v27 }
 0x137   :  { %900 = vmatprep.subr.bf16.mxu0 %v1030_v54 }
 0x139   :  { %856 = vmatmul.mubr.msk.bf16.vlgmr.msra.gmra.mrb[0].mxu0 %vm149_vm6, %v115_v28 }
 0x13a   :  { %873 = vmatprep.mubr.msk.f32.mxu0 %vm1022_vm2, %v1020_v7  ;;  %902 = vmatpush3.bf16.msra.mxu0 %v901_v53 }
 0x13b   :  { %903 = vmatprep.subr.bf16.mxu0 %v1030_v54 }
 0x13e   :  { %v147_v29 = vpop.permute.xlu1 %146  ;;  %905 = vmatpush3.bf16.msra.mxu0 %v904_v6 }
 0x13f   :  { %882 = vmatprep.subr.bf16.mxu0 %v1020_v7 }
 0x20c   :  { %v191_v30 = vpop.f32.mrb[0].mxu0 }
 0x20d   :  { %v192_v31 = vadd.f32 %v191_v30, %v147_v29  ;;  %v857_v32 = vpop.f32.mrb[1].mxu0 }
 0x20e   :  { %v194_v33 = vpop.f32.mrb[2].mxu0 }
 0x20f   :  { %vm197_vm7 = vcmp.ge.f32.partialorder %v192_v31, 0.0  ;;  %v198_v34 = vmul.f32 0.01, %v192_v31  ;;  %v858_v35 = vpop.f32.mrb[3].mxu0 }
 0x211   :  { %v199_v36 = vsel %vm197_vm7, %v192_v31, %v198_v34 }
 0x212   :  { %204 = vrot.lane.b32.xlu1 %v199_v36, %s1018_s15  ;;  %201 = vrot.lane.b32.xlu0 %v199_v36, %s1017_s14 }
 0x216   :  { %215 = vrot.lane.b32.xlu1 %v199_v36, %s1027_s2  ;;  %212 = vrot.lane.b32.xlu0 %v199_v36, %s1028_s20 }
 0x21a   :  { %218 = vrot.lane.b32.xlu1 %v199_v36, %s1029_s21  ;;  %207 = vrot.lane.b32.xlu0 %v199_v36, %s1019_s1 }
 0x284   :  { %v205_v37 = vpop.permute.xlu1 %204  ;;  %v202_v38 = vpop.permute.xlu0 %201 }
 0x285   :  { %v210_v41 = vsel %vm99_vm0, %v202_v38, %v205_v37 }
 0x288   :  { %v216_v39 = vpop.permute.xlu1 %215  ;;  %v213_v40 = vpop.permute.xlu0 %212 }
 0x289   :  { %v221_v42 = vsel %vm99_vm0, %v213_v40, %v216_v39  ;;  %v406_v39 = vld [vmem:[%s1318_s6] sm:$0x3] }
 0x28c   :  { %v219_v43 = vpop.permute.xlu1 %218  ;;  %v208_v44 = vpop.permute.xlu0 %207 }
 0x28d   :  { %v222_v45 = vsel %vm101_vm1, %v221_v42, %v219_v43  ;;  %v211_v46 = vsel %vm101_vm1, %v210_v41, %v208_v44  ;;  %vm741_vm1 = vcmask 31744  }
 0x28e   :  { %v224_v47 = vadd.f32 %v222_v45, %v1166_v12  ;;  %v223_v48 = vadd.f32 %v211_v46, %v1169_v13 }
 0x290   :  { %237 = vrot.lane.b32.xlu1 %v224_v47, %s1021_s5  ;;  %234 = vrot.lane.b32.xlu0 %v223_v48, %s1017_s14  ;;  %s1035_s5 = smov 6  }
 0x294   :  { %241 = vrot.lane.b32.xlu1 %v223_v48, %s1024_s16  ;;  %229 = vrot.lane.b32.xlu0 %v224_v47, %s1025_s17 }
 0x298   :  { %255 = vperm.xlu1 %936, %v227_v50   ;;  %244 = vrot.lane.b32.xlu0 %v224_v47, %s1026_s12 }
 0x302   :  { %v235_v55 = vpop.permute.xlu0 %234  ;;  %v238_v56 = vpop.permute.xlu1 %237 }
 0x303   :  { %v240_v57 = vsel %vm121_vm3, %v235_v55, %v238_v56 }
 0x304   :  { %v249_v60 = vrot.slane %v240_v57, 4 }
 0x306   :  { %v230_v58 = vpop.permute.xlu0 %229  ;;  %v242_v61 = vpop.permute.xlu1 %241 }
 0x307   :  { %v232_v59 = vsel %vm121_vm3, %v223_v48, %v230_v58 }
 0x308   :  { %v251_v0 = vsel %vm141_vm4, %v232_v59, %v249_v60  ;;  %v514_v60 = vld [vmem:[%s1321_s9] sm:$0xf] }
 0x30a   :  { %v245_v62 = vpop.permute.xlu0 %244 }
 0x30b   :  { %v247_v63 = vsel %vm121_vm3, %v242_v61, %v245_v62  ;;  %v515_v61 = vmul.f32 2.0, %v514_v60 }
 0x30c   :  { %v252_v1 = vpack.c.bf16 %v247_v63, %v251_v0 }
 0x30e   :  { %v262_v2 = vsel %vm153_vm5, %v252_v1, 0 }
 0x30f   :  { %860 = vmatpush3.bf16.msra.mxu1 %v262_v2 }
 0x310   :  { %876 = vmatprep.subr.bf16.mxu1 %v1020_v7 }
 0x312   :  { %862 = vmatmul.mubr.msk.bf16.vlgmr.msra.gmra.mrb[0].mxu1 %vm149_vm6, %v225_v3 }
 0x313   :  { %878 = vmatprep.mubr.msk.bf16.mxu1 %vm1022_vm2, %v1020_v7 }
 0x317   :  { %v256_v8 = vpop.permute.xlu1 %255 }
 0x3e5   :  { %v298_v9 = vpop.f32.mrb[0].mxu1 }
 0x3e6   :  { %v299_v10 = vadd.f32 %v298_v9, %v256_v8  ;;  %v863_v11 = vpop.f32.mrb[1].mxu1 }
 0x3e7   :  { %v301_v12 = vpop.f32.mrb[2].mxu1  ;;  %v513_v11 = vld [vmem:[%s1320_s8] sm:$0x3]  ;;  %s1036_s8 = smov 124  }
 0x3e8   :  { %v864_v13 = vpop.f32.mrb[3].mxu1  ;;  %874 = vmatmul.mubr.msk.f32.vlgmr.msra.gmra.mrb[4].mxu0 %vm308_vm8, %v299_v10  ;;  %v592_v12 = vld [vmem:[%s1322_s10] sm:$0xff] }
 0x3e9   :  { %884 = vmatprep.mubr.msk.bf16.mxu0 %vm1022_vm2, %v1020_v7  ;;  %v593_v13 = vld [vmem:[%s1322_s10 + $0x8] sm:$0xff] }
 0x4bb   :  { %v378_v14 = vpop.f32.mrb[4].mxu0 }
 0x4bc   :  { %386 = vrot.lane.b32.xlu1 %v378_v14, %s1018_s15  ;;  %383 = vrot.lane.b32.xlu0 %v378_v14, %s1017_s14  ;;  %v875_v15 = vpop.f32.mrb[5].mxu0 }
 0x4c0   :  { %398 = vrot.lane.b32.xlu1 %v378_v14, %s1031_s3  ;;  %395 = vrot.lane.b32.xlu0 %v378_v14, %s1032_s25 }
 0x4c4   :  { %401 = vrot.lane.b32.xlu1 %v378_v14, %s1033_s26  ;;  %389 = vrot.lane.b32.xlu0 %v378_v14, %s1019_s1  ;;  %v907_v14 = vpack.c.bf16 %v593_v13, %v592_v12 }
 0x52e   :  { %v387_v16 = vpop.permute.xlu1 %386  ;;  %v384_v17 = vpop.permute.xlu0 %383 }
 0x52f   :  { %v392_v20 = vsel %vm99_vm0, %v384_v17, %v387_v16 }
 0x532   :  { %v399_v18 = vpop.permute.xlu1 %398  ;;  %v396_v19 = vpop.permute.xlu0 %395 }
 0x533   :  { %v404_v21 = vsel %vm99_vm0, %v396_v19, %v399_v18 }
 0x536   :  { %v402_v22 = vpop.permute.xlu1 %401  ;;  %v390_v23 = vpop.permute.xlu0 %389 }
 0x537   :  { %v405_v24 = vsel %vm393_vm9, %v404_v21, %v402_v22  ;;  %v394_v25 = vsel %vm393_vm9, %v392_v20, %v390_v23 }
 0x538   :  { %418 = vrot.lane.b32.xlu1 %v405_v24, %s1034_s0  ;;  %415 = vrot.lane.b32.xlu0 %v394_v25, %s1017_s14 }
 0x53c   :  { %422 = vrot.lane.b32.xlu1 %v394_v25, %s1024_s16  ;;  %409 = vrot.lane.b32.xlu0 %v405_v24, %s1016_s30 }
 0x540   :  { %436 = vperm.xlu1 %936, %v407_v26   ;;  %425 = vrot.lane.b32.xlu0 %v405_v24, %s1035_s5 }
 0x5aa   :  { %v416_v27 = vpop.permute.xlu0 %415  ;;  %v419_v28 = vpop.permute.xlu1 %418 }
 0x5ab   :  { %v421_v29 = vsel %vm412_vm10, %v416_v27, %v419_v28 }
 0x5ac   :  { %v430_v32 = vrot.slane %v421_v29, 4 }
 0x5ae   :  { %v410_v30 = vpop.permute.xlu0 %409  ;;  %v423_v33 = vpop.permute.xlu1 %422 }
 0x5af   :  { %v413_v31 = vsel %vm412_vm10, %v394_v25, %v410_v30 }
 0x5b0   :  { %v432_v35 = vsel %vm141_vm4, %v413_v31, %v430_v32 }
 0x5b2   :  { %v426_v34 = vpop.permute.xlu0 %425 }
 0x5b3   :  { %v428_v36 = vsel %vm412_vm10, %v423_v33, %v426_v34 }
 0x5b4   :  { %v433_v37 = vpack.c.bf16 %v428_v36, %v432_v35 }
 0x5b6   :  { %v443_v38 = vsel %vm153_vm5, %v433_v37, 0 }
 0x5b7   :  { %877 = vmatpush3.bf16.msra.mxu1 %v443_v38 }
 0x5b8   :  { %906 = vmatprep.subr.bf16.mxu1 %v1030_v54 }
 0x5ba   :  { %879 = vmatmul.mubr.msk.bf16.vlgmr.msra.gmra.mrb[4].mxu1 %vm149_vm6, %v406_v39 }
 0x5bb   :  { %892 = vmatprep.mubr.msk.f32.mxu1 %vm1022_vm2, %v1020_v7  ;;  %908 = vmatpush3.bf16.msra.mxu1 %v907_v14 }
 0x5bf   :  { %v437_v40 = vpop.permute.xlu1 %436 }
 0x68d   :  { %v479_v41 = vpop.f32.mrb[4].mxu1 }
 0x68e   :  { %v480_v42 = vadd.f32 %v479_v41, %v437_v40  ;;  %v880_v43 = vpop.f32.mrb[5].mxu1  ;;  %v733_v41 = vld [vmem:[%s1323_s11] sm:$0xf] }
 0x68f   :  { %v482_v44 = vpop.f32.mrb[6].mxu1 }
 0x690   :  { %vm485_vm11 = vcmp.ge.f32.partialorder %v480_v42, 0.0  ;;  %v486_v45 = vmul.f32 0.01, %v480_v42  ;;  %v881_v46 = vpop.f32.mrb[7].mxu1 }
 0x692   :  { %v487_v47 = vsel %vm485_vm11, %v480_v42, %v486_v45 }
 0x693   :  { %492 = vrot.lane.b32.xlu1 %v487_v47, %s1018_s15  ;;  %489 = vrot.lane.b32.xlu0 %v487_v47, %s1017_s14 }
 0x697   :  { %503 = vrot.lane.b32.xlu1 %v487_v47, %s1031_s3  ;;  %500 = vrot.lane.b32.xlu0 %v487_v47, %s1032_s25 }
 0x69b   :  { %506 = vrot.lane.b32.xlu1 %v487_v47, %s1033_s26  ;;  %495 = vrot.lane.b32.xlu0 %v487_v47, %s1019_s1 }
 0x705   :  { %v493_v48 = vpop.permute.xlu1 %492  ;;  %v490_v49 = vpop.permute.xlu0 %489 }
 0x706   :  { %v498_v52 = vsel %vm99_vm0, %v490_v49, %v493_v48 }
 0x709   :  { %v504_v50 = vpop.permute.xlu1 %503  ;;  %v501_v51 = vpop.permute.xlu0 %500 }
 0x70a   :  { %v509_v53 = vsel %vm99_vm0, %v501_v51, %v504_v50  ;;  %vm731_vm0 = vcmask 1040384  }
 0x70d   :  { %v507_v54 = vpop.permute.xlu1 %506  ;;  %v496_v55 = vpop.permute.xlu0 %495 }
 0x70e   :  { %v510_v56 = vsel %vm393_vm9, %v509_v53, %v507_v54  ;;  %v499_v57 = vsel %vm393_vm9, %v498_v52, %v496_v55 }
 0x70f   :  { %v512_v58 = vadd.f32 %v510_v56, %v405_v24  ;;  %v511_v59 = vadd.f32 %v499_v57, %v394_v25 }
 0x711   :  { %525 = vrot.lane.b32.xlu1 %v512_v58, %s1034_s0  ;;  %522 = vrot.lane.b32.xlu0 %v511_v59, %s1017_s14 }
 0x715   :  { %529 = vrot.lane.b32.xlu1 %v511_v59, %s1024_s16  ;;  %517 = vrot.lane.b32.xlu0 %v512_v58, %s1016_s30 }
 0x719   :  { %543 = vperm.xlu1 %936, %v515_v61   ;;  %532 = vrot.lane.b32.xlu0 %v512_v58, %s1035_s5 }
 0x783   :  { %v523_v62 = vpop.permute.xlu0 %522  ;;  %v526_v63 = vpop.permute.xlu1 %525 }
 0x784   :  { %v528_v0 = vsel %vm412_vm10, %v523_v62, %v526_v63 }
 0x785   :  { %v537_v3 = vrot.slane %v528_v0, 4 }
 0x787   :  { %v518_v1 = vpop.permute.xlu0 %517  ;;  %v530_v4 = vpop.permute.xlu1 %529 }
 0x788   :  { %v520_v2 = vsel %vm412_vm10, %v511_v59, %v518_v1 }
 0x789   :  { %v539_v6 = vsel %vm141_vm4, %v520_v2, %v537_v3 }
 0x78b   :  { %v533_v5 = vpop.permute.xlu0 %532 }
 0x78c   :  { %v535_v8 = vsel %vm412_vm10, %v530_v4, %v533_v5 }
 0x78d   :  { %v540_v9 = vpack.c.bf16 %v535_v8, %v539_v6  ;;  %v832_v6 = vld [vmem:[#allocation2] ss:$0 sm:$0xff] }
 0x78f   :  { %v550_v10 = vsel %vm153_vm5, %v540_v9, 0 }
 0x790   :  { %883 = vmatpush3.bf16.msra.mxu0 %v550_v10 }
 0x791   :  { %895 = vmatprep.subr.mxu0 %v1020_v7 }
 0x793   :  { %885 = vmatmul.mubr.msk.bf16.vlgmr.msra.gmra.mrb[8].mxu0 %vm149_vm6, %v513_v11 }
 0x794   :  { %897 = vmatprep.mubr.msk.f32.mxu0 %vm1022_vm2, %v1020_v7  ;;  %896 = vmatpush3.msk.msra.mxu0 %vm141_vm4, %v733_v41  ;;  %vm818_vm2 = vcmask 1024  }
 0x798   :  { %v544_v15 = vpop.permute.xlu1 %543 }
 0x866   :  { %v586_v16 = vpop.f32.mrb[8].mxu0 }
 0x867   :  { %v587_v17 = vadd.f32 %v586_v16, %v544_v15  ;;  %v886_v18 = vpop.f32.mrb[9].mxu0 }
 0x868   :  { %v589_v19 = vpop.f32.mrb[10].mxu0 }
 0x869   :  { %893 = vmatmul.mubr.msk.f32.vlgmr.msra.gmra.mrb[8].mxu1 %vm121_vm3, %v587_v17  ;;  %v887_v20 = vpop.f32.mrb[11].mxu0 }
 0x93c   :  { %v663_v21 = vpop.f32.mrb[8].mxu1 }
 0x93d   :  { %v667_v7 = vmax.f32 %v663_v21, 0.0  ;;  %v894_v22 = vpop.f32.mrb[9].mxu1 }
 0x93f   :  { %669 = vrot.lane.b32.xlu0 %v667_v7, %s1036_s8  ;;  %v719_v42 = vsel %vm718_vm15, %v667_v7, 0.0  ;;  %v710_v60 = vsel %vm696_vm14, %v667_v7, 0.0 }
 0x940   :  { %v720_v43 = vrot.slane %v719_v42, 4  ;;  %v711_v61 = vrot.slane %v710_v60, 4 }
 0x942   :  { %v721_v45 = vadd.f32 %v720_v43, %v719_v42  ;;  %v712_v62 = vadd.f32 %v711_v61, %v710_v60 }
 0x944   :  { %v722_v49 = vrot.slane %v721_v45, 2  ;;  %v713_v63 = vrot.slane %v712_v62, 2 }
 0x946   :  { %v723_v52 = vadd.f32 %v722_v49, %v721_v45  ;;  %v714_v0 = vadd.f32 %v713_v63, %v712_v62 }
 0x948   :  { %v724_v55 = vrot.slane %v723_v52, 1  ;;  %v715_v1 = vrot.slane %v714_v0, 1 }
 0x94a   :  { %v725_v58 = vadd.f32 %v724_v55, %v723_v52  ;;  %v716_v2 = vadd.f32 %v715_v1, %v714_v0 }
 0x9b1   :  { %v670_v23 = vpop.permute.xlu0 %669 }
 0x9b2   :  { %v672_v24 = vadd.f32 %v670_v23, %v667_v7 }
 0x9b4   :  { %v673_v25 = vmul.f32 0.5, %v672_v24 }
 0x9b6   :  { %677 = vrot.lane.b32.xlu1 %v673_v25, %s1013_s28  ;;  %v674_v29 = vsub.f32 %v667_v7, %v673_v25 }
 0x9b8   :  { %v675_v30 = vmul.f32 %v674_v29, %v674_v29 }
 0xa28   :  { %v678_v26 = vpop.permute.xlu1 %677 }
 0xa29   :  { %v680_v27 = vsub.f32 %v667_v7, %v678_v26 }
 0xa2b   :  { %v681_v28 = vmul.f32 %v680_v27, %v680_v27 }
 0xa2d   :  { %683 = vrot.lane.b32.xlu0 %v681_v28, %s1036_s8 }
 0xa9f   :  { %v684_v31 = vpop.permute.xlu0 %683 }
 0xaa0   :  { %v686_v32 = vadd.f32 %v684_v31, %v675_v30 }
 0xaa2   :  { %v687_v33 = vmul.f32 0.5, %v686_v32 }
 0xaa4   :  { %v688_v34 = vadd.f32 1e-08, %v687_v33 }
 0xaa6   :  { %938 = vrsqrt.f32 %v688_v34  ;;  %vm691_vm12 = vcmp.eq.f32.partialorder %v688_v34, inf  ;;  %v694_v37 = vand.u32 2147483648, %v688_v34  ;;  %vm693_vm13 = vcmp.eq.f32.partialorder %v688_v34, 0.0 }
 0xab0   :  { %v939_v35 = vpop.eup %938 }
 0xab1   :  { %v690_v36 = vmul.f32 %v939_v35, %v688_v34 }
 0xab3   :  { %v692_v38 = vsel %vm691_vm12, %v688_v34, %v690_v36 }
 0xab4   :  { %v695_v39 = vsel %vm693_vm13, %v694_v37, %v692_v38 }
 0xab5   :  { %v697_v40 = vsel %vm696_vm14, %v695_v39, 0.0 }
 0xab6   :  { %698 = vadd.xlane.f32.xlu1 %v697_v40 }
 0xb43   :  { %v699_v44 = vpop.xlane.xlu1 %698 }
 0xb44   :  { %v701_v46 = vmul.f32 0.25, %v699_v44 }
 0xb46   :  { %v702_v47 = vsel %vm141_vm4, %v701_v46, 0.0 }
 0xb47   :  { %v703_v48 = vrot.slane %v702_v47, 4 }
 0xb49   :  { %v704_v50 = vadd.f32 %v703_v48, %v702_v47 }
 0xb4b   :  { %v705_v51 = vrot.slane %v704_v50, 2 }
 0xb4d   :  { %v706_v53 = vadd.f32 %v705_v51, %v704_v50 }
 0xb4f   :  { %v707_v54 = vrot.slane %v706_v53, 1 }
 0xb51   :  { %v708_v56 = vadd.f32 %v707_v54, %v706_v53 }
 0xb53   :  { %v709_v57 = vmul.f32 0.25, %v708_v56 }
 0xb55   :  { %v726_v59 = vadd.f32 %v725_v58, %v709_v57  ;;  %v717_v3 = vadd.f32 %v716_v2, %v709_v57 }
 0xb57   :  { %728 = vrot.lane.b32.xlu0 %v726_v59, %s1036_s8 }
 0xbc9   :  { %v729_v4 = vpop.permute.xlu0 %728 }
 0xbca   :  { %v732_v5 = vsel %vm731_vm0, %v717_v3, %v729_v4 }
 0xbcb   :  { %898 = vmatmul.mubr.msk.f32.vlgmr.msra.gmra.mrb[6].mxu0 %vm741_vm1, %v732_v5 }
 0xc9e   :  { %v814_v8 = vpop.f32.mrb[6].mxu0 }
 0xc9f   :  { %v815_v9 = vadd.f32 %v832_v6, %v814_v8  ;;  %v899_v10 = vpop.f32.mrb[7].mxu0 }
 0xca1   :  { %819 = vst.msk [vmem:[%s1325_s13] sm:$0x3] %vm818_vm2, %v815_v9 }
 0xca2   :  { %824 = vsyncpa [#allocation4], 1 }
 0xca3   :  { %825 = vsyncpa [#allocation6], 1 }

</bundles_post_ra>
